<compile_context>
chip_gen: v7x
topology: tpu7x:2x2x1
jax: 0.10.0
libtpu: 0.0.40
codegen_flags: <defaults>
</compile_context>

<pallas_src>
import jax
import jax.numpy as jnp
from jax.experimental import pallas as pl
from jax.experimental.pallas import tpu as pltpu


# ----------------------------- Pallas kernel ------------------------------

def _attn_gate_kernel(g_ref, x_ref, wg_ref, wx_ref, bgx_ref, wpsi_ref,
                      bpsi_ref, o_ref, psi_ref):
    # Blocks are (1, C, TP); pixels on the lane / MXU-N axis.
    g = g_ref[0]                                    # (F_g, TP) bf16
    x = x_ref[0]                                    # (F_l, TP) bf16

    # Two accumulating 1x1 convs (split weights, no in-VMEM concat).
    pre = (jnp.dot(wg_ref[...], g, preferred_element_type=jnp.float32)
           + jnp.dot(wx_ref[...], x, preferred_element_type=jnp.float32)
           + bgx_ref[...])                          # (F_int, TP) f32
    p = jnp.maximum(pre, 0.0)                       # ReLU

    # psi 1x1 conv (single output channel), bf16 operands, f32 accumulate.
    z = jnp.dot(wpsi_ref[...], p.astype(jnp.bfloat16),
                preferred_element_type=jnp.float32) + bpsi_ref[0]   # (1, TP)

    # Numerically symmetric sigmoid: exp argument is always <= 0, so the
    # approximate EUP reciprocal never sees inf.
    e = jnp.exp(-jnp.abs(z))                        # in (0, 1]
    r = pl.reciprocal(1.0 + e, approx=True)         # in [0.5, 1)
    psi = jnp.where(z >= 0, r, e * r)               # (1, TP)

    psi_ref[0] = psi.astype(psi_ref.dtype)
    o_ref[0] = (x.astype(jnp.float32) * psi).astype(o_ref.dtype)


# ------------------------------ tiling logic -------------------------------

def _round_up(v, m):
    return ((v + m - 1) // m) * m


def _compute_tiling(HW, B, F_g, F_l, act_bytes, out_bytes):
    """Pick pixel tile TP, padded pixel count, and a per-generation VMEM cap."""
    try:
        vmem_cap = int(pltpu.get_tpu_info().vmem_capacity_bytes)
    except Exception:
        vmem_cap = 64 * 1024 * 1024            # conservative (v7x per-TC)
    # <= ~48 MiB on v7x (64 MiB physical), up to 96 MiB on v5e/v6e (128 MiB).
    vmem_limit = min((vmem_cap * 3) // 4, 96 * 1024 * 1024)

    # Double-buffered pipeline bytes per pixel (bf16 inputs, out_dtype outputs).
    bytes_per_pixel = 2 * ((F_g + F_l) * act_bytes + (F_l + 1) * out_bytes)
    budget = (vmem_limit * 3) // 4             # headroom for weights / vregs
    tp = max(512, (budget // bytes_per_pixel) // 512 * 512)

    # Keep >= ~8 grid steps (when there is enough work) so v7x's two
    # TensorCores share the grid and double-buffering has work to overlap.
    min_steps = 8
    if B * HW > min_steps * 512:
        per_batch = -(-min_steps // B)                       # ceil
        tp = min(tp, _round_up(-(-HW // per_batch), 512))

    if tp >= HW:
        tp = _round_up(HW, 128)                # single lane-dense tile
        hw_pad = tp
    else:
        n = -(-HW // tp)                       # number of pixel tiles
        tp = _round_up(-(-HW // n), 512)       # rebalance to minimize padding
        hw_pad = tp * n
    return tp, hw_pad, int(vmem_limit)


# ------------------------------- wrapper -----------------------------------

def attention_gate_forward(params, g, x, *, act_dtype=jnp.bfloat16,
                           out_dtype=jnp.float32):
    """g: (B, F_g, H, W), x: (B, F_l, H, W) -> (x * psi, psi), both NCHW."""
    B, F_g, H, W = g.shape
    Bx, F_l, Hx, Wx = x.shape
    assert B == Bx and (H, W) == (Hx, Wx)
    HW = H * W
    F_int = params["w_g"].shape[0]

    act_bytes = jnp.dtype(act_dtype).itemsize
    out_bytes = jnp.dtype(out_dtype).itemsize
    TP, HW_pad, vmem_limit = _compute_tiling(HW, B, F_g, F_l,
                                             act_bytes, out_bytes)

    # NCHW -> (B, C, H*W): channels-first slab, pixels last (lane-dense).
    g2 = g.reshape(B, F_g, HW).astype(act_dtype)
    x2 = x.reshape(B, F_l, HW).astype(act_dtype)
    if HW_pad != HW:
        pad = HW_pad - HW
        g2 = jnp.pad(g2, ((0, 0), (0, 0), (0, pad)))
        x2 = jnp.pad(x2, ((0, 0), (0, 0), (0, pad)))

    grid = (B, HW_pad // TP)

    out, psi = pl.pallas_call(
        _attn_gate_kernel,
        out_shape=(jax.ShapeDtypeStruct((B, F_l, HW_pad), out_dtype),
                   jax.ShapeDtypeStruct((B, 1, HW_pad), out_dtype)),
        grid=grid,
        in_specs=[
            pl.BlockSpec((1, F_g, TP), lambda b, p: (b, 0, p)),
            pl.BlockSpec((1, F_l, TP), lambda b, p: (b, 0, p)),
            pl.BlockSpec((F_int, F_g), lambda b, p: (0, 0)),
            pl.BlockSpec((F_int, F_l), lambda b, p: (0, 0)),
            pl.BlockSpec((F_int, 1), lambda b, p: (0, 0)),
            pl.BlockSpec((1, F_int), lambda b, p: (0, 0)),
            pl.BlockSpec(memory_space=pltpu.MemorySpace.SMEM),   # b_psi scalar
        ],
        out_specs=(
            pl.BlockSpec((1, F_l, TP), lambda b, p: (b, 0, p)),
            pl.BlockSpec((1, 1, TP), lambda b, p: (b, 0, p)),
        ),
        compiler_params=pltpu.CompilerParams(
            dimension_semantics=("parallel", "parallel"),
            vmem_limit_bytes=vmem_limit,
        ),
    )(g2, x2, params["w_g"], params["w_x"], params["b_gx"],
      params["w_psi"], params["b_psi"])

    if HW_pad != HW:
        out = out[:, :, :HW]
        psi = psi[:, :, :HW]
    return out.reshape(B, F_l, H, W), psi.reshape(B, 1, H, W)


# --------------------------- parameter plumbing ----------------------------

def _fold_bn(w, b, gamma, beta, mean, var, eps=1e-5):
    """Fold eval-mode BatchNorm into a 1x1 conv: w (out,in), b (out,)."""
    scale = gamma / jnp.sqrt(var + eps)
    return w * scale[:, None], (b - mean) * scale + beta


def fold_params(raw, eps=1e-5):
    wg_f, bg_f = _fold_bn(raw["wg"], raw["bg"], *raw["bn_g"], eps=eps)
    wx_f, bx_f = _fold_bn(raw["wx"], raw["bx"], *raw["bn_x"], eps=eps)
    wp_f, bp_f = _fold_bn(raw["wpsi"], raw["bpsi"], *raw["bn_psi"], eps=eps)
    f_int = wg_f.shape[0]
    return dict(
        w_g=wg_f.astype(jnp.bfloat16),                       # (F_int, F_g)
        w_x=wx_f.astype(jnp.bfloat16),                       # (F_int, F_l)
        b_gx=(bg_f + bx_f).reshape(f_int, 1).astype(jnp.float32),
        w_psi=wp_f.reshape(1, f_int).astype(jnp.bfloat16),   # (1, F_int)
        b_psi=bp_f.reshape(1).astype(jnp.float32),           # SMEM scalar
    )


def attention_gate_reference(raw, g, x, eps=1e-5):
    """Pure-JAX eval-mode reference (matches the PyTorch module)."""
    def conv1x1(t, w, b):
        return jnp.einsum("oc,bchw->bohw", w, t) + b[None, :, None, None]

    def bn(t, p):
        gamma, beta, mean, var = p
        s = gamma / jnp.sqrt(var + eps)
        return (t - mean[None, :, None, None]) * s[None, :, None, None] \
            + beta[None, :, None, None]

    g1 = bn(conv1x1(g, raw["wg"], raw["bg"]), raw["bn_g"])
    x1 = bn(conv1x1(x, raw["wx"], raw["bx"]), raw["bn_x"])
    p = jnp.maximum(g1 + x1, 0.0)
    psi = jax.nn.sigmoid(bn(conv1x1(p, raw["wpsi"], raw["bpsi"]), raw["bn_psi"]))
    return x * psi, psi


# --------------------------------- demo ------------------------------------

if __name__ == "__main__":
    B, F_g, F_l, F_int, H, W = 2, 8, 8, 4, 16, 16

    key = jax.random.PRNGKey(0)
    ks = jax.random.split(key, 12)

    def rnd(k, shape, scale=0.2):
        return scale * jax.random.normal(k, shape, dtype=jnp.float32)

    def make_bn(k, c):
        k1, k2, k3, k4 = jax.random.split(k, 4)
        gamma = 1.0 + 0.1 * jax.random.normal(k1, (c,), jnp.float32)
        beta = 0.1 * jax.random.normal(k2, (c,), jnp.float32)
        mean = 0.1 * jax.random.normal(k3, (c,), jnp.float32)
        var = 1.0 + 0.1 * jnp.abs(jax.random.normal(k4, (c,), jnp.float32))
        return gamma, beta, mean, var

    raw = dict(
        wg=rnd(ks[0], (F_int, F_g)), bg=rnd(ks[1], (F_int,)),
        wx=rnd(ks[2], (F_int, F_l)), bx=rnd(ks[3], (F_int,)),
        wpsi=rnd(ks[4], (1, F_int)), bpsi=rnd(ks[5], (1,)),
        bn_g=make_bn(ks[6], F_int),
        bn_x=make_bn(ks[7], F_int),
        bn_psi=make_bn(ks[8], 1),
    )
    params = fold_params(raw)

    g = jax.random.normal(ks[9], (B, F_g, H, W), jnp.float32)
    x = jax.random.normal(ks[10], (B, F_l, H, W), jnp.float32)

    out, psi = attention_gate_forward(params, g, x)
    out, psi = jax.block_until_ready((out, psi))

    assert out.shape == (B, F_l, H, W)
    assert psi.shape == (B, 1, H, W)
    assert bool(jnp.all(jnp.isfinite(out))) and bool(jnp.all(jnp.isfinite(psi)))

    out_ref, psi_ref = attention_gate_reference(raw, g, x)
    assert float(jnp.max(jnp.abs(out - out_ref))) < 5e-2
    assert float(jnp.max(jnp.abs(psi - psi_ref))) < 5e-2

    print("KERNEL_OK")
</pallas_src>

<mosaic_0001>
module attributes {stable_mosaic.version = 11 : i64} {
  func.func @_attn_gate_kernel(%arg0: i32, %arg1: i32, %arg2: memref<1x8x256xbf16, #tpu.memory_space<vmem>>, %arg3: memref<1x8x256xbf16, #tpu.memory_space<vmem>>, %arg4: memref<4x8xbf16, #tpu.memory_space<vmem>>, %arg5: memref<4x8xbf16, #tpu.memory_space<vmem>>, %arg6: memref<4x1xf32, #tpu.memory_space<vmem>>, %arg7: memref<1x4xbf16, #tpu.memory_space<vmem>>, %arg8: memref<1xf32, #tpu.memory_space<smem>>, %arg9: memref<1x8x256xf32, #tpu.memory_space<vmem>>, %arg10: memref<1x1x256xf32, #tpu.memory_space<vmem>>) attributes {dimension_semantics = [#tpu.dimension_semantics<parallel>, #tpu.dimension_semantics<parallel>], iteration_bounds = array<i64: 2, 1>, scalar_prefetch = 0 : i64, scratch_operands = 0 : i64, tpu.core_type = #tpu.core_type<tc>, window_params = [{transform_indices = @transform_0, window_bounds = array<i64: 1, 8, 256>}, {transform_indices = @transform_1, window_bounds = array<i64: 1, 8, 256>}, {pipeline_mode = #tpu.pipeline_mode<synchronous>, transform_indices = @transform_2, window_bounds = array<i64: 4, 8>}, {pipeline_mode = #tpu.pipeline_mode<synchronous>, transform_indices = @transform_3, window_bounds = array<i64: 4, 8>}, {pipeline_mode = #tpu.pipeline_mode<synchronous>, transform_indices = @transform_4, window_bounds = array<i64: 4, 1>}, {pipeline_mode = #tpu.pipeline_mode<synchronous>, transform_indices = @transform_5, window_bounds = array<i64: 1, 4>}, {transform_indices = @transform_6, window_bounds = array<i64: 1>}, {transform_indices = @transform_7, window_bounds = array<i64: 1, 8, 256>}, {transform_indices = @transform_8, window_bounds = array<i64: 1, 1, 256>}]} {
    %c0 = arith.constant 0 : index
    %c0_0 = arith.constant 0 : index
    %c0_1 = arith.constant 0 : index
    %0 = vector.load %arg2[%c0, %c0_0, %c0_1] : memref<1x8x256xbf16, #tpu.memory_space<vmem>>, vector<1x8x256xbf16>
    %1 = vector.shape_cast %0 : vector<1x8x256xbf16> to vector<8x256xbf16>
    %c0_2 = arith.constant 0 : index
    %c0_3 = arith.constant 0 : index
    %c0_4 = arith.constant 0 : index
    %2 = vector.load %arg3[%c0_2, %c0_3, %c0_4] : memref<1x8x256xbf16, #tpu.memory_space<vmem>>, vector<1x8x256xbf16>
    %3 = vector.shape_cast %2 : vector<1x8x256xbf16> to vector<8x256xbf16>
    %c0_5 = arith.constant 0 : index
    %c0_6 = arith.constant 0 : index
    %4 = vector.load %arg4[%c0_5, %c0_6] : memref<4x8xbf16, #tpu.memory_space<vmem>>, vector<4x8xbf16>
    %cst = arith.constant dense<0.000000e+00> : vector<4x256xf32>
    %5 = tpu.matmul %4, %1, %cst {dimension_numbers = #tpu.dot_dimension_numbers<[1], [0], [0], [1], [0, 0, 1, 1], [], []>} : vector<4x8xbf16>, vector<8x256xbf16>, vector<4x256xf32> -> vector<4x256xf32>
    %c0_7 = arith.constant 0 : index
    %c0_8 = arith.constant 0 : index
    %6 = vector.load %arg5[%c0_7, %c0_8] : memref<4x8xbf16, #tpu.memory_space<vmem>>, vector<4x8xbf16>
    %cst_9 = arith.constant dense<0.000000e+00> : vector<4x256xf32>
    %7 = tpu.matmul %6, %3, %cst_9 {dimension_numbers = #tpu.dot_dimension_numbers<[1], [0], [0], [1], [0, 0, 1, 1], [], []>} : vector<4x8xbf16>, vector<8x256xbf16>, vector<4x256xf32> -> vector<4x256xf32>
    %8 = arith.addf %5, %7 : vector<4x256xf32>
    %c0_10 = arith.constant 0 : index
    %c0_11 = arith.constant 0 : index
    %9 = vector.load %arg6[%c0_10, %c0_11] : memref<4x1xf32, #tpu.memory_space<vmem>>, vector<4x1xf32>
    %10 = vector.broadcast %9 : vector<4x1xf32> to vector<4x256xf32>
    %11 = arith.addf %8, %10 : vector<4x256xf32>
    %cst_12 = arith.constant 0.000000e+00 : f32
    %12 = vector.broadcast %cst_12 : f32 to vector<4x256xf32>
    %13 = arith.maximumf %11, %12 : vector<4x256xf32>
    %c0_13 = arith.constant 0 : index
    %c0_14 = arith.constant 0 : index
    %14 = vector.load %arg7[%c0_13, %c0_14] : memref<1x4xbf16, #tpu.memory_space<vmem>>, vector<1x4xbf16>
    %15 = arith.truncf %13 : vector<4x256xf32> to vector<4x256xbf16>
    %cst_15 = arith.constant dense<0.000000e+00> : vector<1x256xf32>
    %16 = tpu.matmul %14, %15, %cst_15 {dimension_numbers = #tpu.dot_dimension_numbers<[1], [0], [0], [1], [0, 0, 1, 1], [], []>} : vector<1x4xbf16>, vector<4x256xbf16>, vector<1x256xf32> -> vector<1x256xf32>
    %c0_16 = arith.constant 0 : index
    %17 = memref.load %arg8[%c0_16] : memref<1xf32, #tpu.memory_space<smem>>
    %18 = vector.broadcast %17 : f32 to vector<1x256xf32>
    %19 = arith.addf %16, %18 : vector<1x256xf32>
    %20 = math.absf %19 : vector<1x256xf32>
    %cst_17 = arith.constant 0.000000e+00 : f32
    %21 = vector.broadcast %cst_17 : f32 to vector<1x256xf32>
    %22 = arith.subf %21, %20 : vector<1x256xf32>
    %23 = math.exp %22 : vector<1x256xf32>
    %cst_18 = arith.constant 1.000000e+00 : f32
    %24 = vector.broadcast %cst_18 : f32 to vector<1x256xf32>
    %25 = arith.addf %24, %23 : vector<1x256xf32>
    %26 = tpu.reciprocal %25 {approx = true} : vector<1x256xf32> -> vector<1x256xf32>
    %cst_19 = arith.constant 0.000000e+00 : f32
    %27 = vector.broadcast %cst_19 : f32 to vector<1x256xf32>
    %28 = arith.cmpf oge, %19, %27 : vector<1x256xf32>
    %29 = arith.mulf %23, %26 : vector<1x256xf32>
    %30 = arith.select %28, %26, %29 : vector<1x256xi1>, vector<1x256xf32>
    %c0_20 = arith.constant 0 : index
    %c0_21 = arith.constant 0 : index
    %c0_22 = arith.constant 0 : index
    %31 = vector.load %arg10[%c0_20, %c0_21, %c0_22] : memref<1x1x256xf32, #tpu.memory_space<vmem>>, vector<1x1x256xf32>
    %32 = vector.shape_cast %31 : vector<1x1x256xf32> to vector<1x256xf32>
    %33 = vector.shape_cast %30 : vector<1x256xf32> to vector<1x1x256xf32>
    tpu.vector_store %arg10[%c0_20, %c0_21, %c0_22], %33 {strides = array<i32>} : memref<1x1x256xf32, #tpu.memory_space<vmem>>, vector<1x1x256xf32>,
    %34 = arith.extf %3 : vector<8x256xbf16> to vector<8x256xf32>
    %35 = vector.broadcast %30 : vector<1x256xf32> to vector<8x256xf32>
    %36 = arith.mulf %34, %35 : vector<8x256xf32>
    %c0_23 = arith.constant 0 : index
    %c0_24 = arith.constant 0 : index
    %c0_25 = arith.constant 0 : index
    %37 = vector.load %arg9[%c0_23, %c0_24, %c0_25] : memref<1x8x256xf32, #tpu.memory_space<vmem>>, vector<1x8x256xf32>
    %38 = vector.shape_cast %37 : vector<1x8x256xf32> to vector<8x256xf32>
    %39 = vector.shape_cast %36 : vector<8x256xf32> to vector<1x8x256xf32>
    tpu.vector_store %arg9[%c0_23, %c0_24, %c0_25], %39 {strides = array<i32>} : memref<1x8x256xf32, #tpu.memory_space<vmem>>, vector<1x8x256xf32>,
    return
  }
  func.func @transform_0(%arg0: i32, %arg1: i32) -> (i32, i32, i32) {
    %c0_i32 = arith.constant 0 : i32
    %c0_i32_0 = arith.constant 0 : i32
    return %arg0, %c0_i32, %arg1 : i32, i32, i32
  }
  func.func @transform_1(%arg0: i32, %arg1: i32) -> (i32, i32, i32) {
    %c0_i32 = arith.constant 0 : i32
    %c0_i32_0 = arith.constant 0 : i32
    return %arg0, %c0_i32, %arg1 : i32, i32, i32
  }
  func.func @transform_2(%arg0: i32, %arg1: i32) -> (i32, i32) {
    %c0_i32 = arith.constant 0 : i32
    %c0_i32_0 = arith.constant 0 : i32
    %c0_i32_1 = arith.constant 0 : i32
    return %c0_i32, %c0_i32_0 : i32, i32
  }
  func.func @transform_3(%arg0: i32, %arg1: i32) -> (i32, i32) {
    %c0_i32 = arith.constant 0 : i32
    %c0_i32_0 = arith.constant 0 : i32
    %c0_i32_1 = arith.constant 0 : i32
    return %c0_i32, %c0_i32_0 : i32, i32
  }
  func.func @transform_4(%arg0: i32, %arg1: i32) -> (i32, i32) {
    %c0_i32 = arith.constant 0 : i32
    %c0_i32_0 = arith.constant 0 : i32
    %c0_i32_1 = arith.constant 0 : i32
    return %c0_i32, %c0_i32_0 : i32, i32
  }
  func.func @transform_5(%arg0: i32, %arg1: i32) -> (i32, i32) {
    %c0_i32 = arith.constant 0 : i32
    %c0_i32_0 = arith.constant 0 : i32
    %c0_i32_1 = arith.constant 0 : i32
    return %c0_i32, %c0_i32_0 : i32, i32
  }
  func.func @transform_6(%arg0: i32, %arg1: i32) -> i32 {
    %c0_i32 = arith.constant 0 : i32
    %c0_i32_0 = arith.constant 0 : i32
    return %c0_i32 : i32
  }
  func.func @transform_7(%arg0: i32, %arg1: i32) -> (i32, i32, i32) {
    %c0_i32 = arith.constant 0 : i32
    %c0_i32_0 = arith.constant 0 : i32
    return %arg0, %c0_i32, %arg1 : i32, i32, i32
  }
  func.func @transform_8(%arg0: i32, %arg1: i32) -> (i32, i32, i32) {
    %c0_i32 = arith.constant 0 : i32
    %c0_i32_0 = arith.constant 0 : i32
    return %arg0, %c0_i32, %arg1 : i32, i32, i32
  }
}

</mosaic_0001>

<bundles_post_ra>
// kernel: tpu_custom_call.1
= control target key start
LH: loop header
LB: loop body
LE: loop exit
PB: predicated region body
PF: predicated region fallthrough
CT: control target
= control target key end

     0   :  { %s1462_s0 = inlined_call_operand.hbm [shape: bf16[2,8,256], index: 0, kind: input, shape index: {}]   ;;  %s1463_s1 = inlined_call_operand.hbm [shape: bf16[2,8,256], index: 1, kind: input, shape index: {}]   ;;  %s1464_s2 = inlined_call_operand.vmem [shape: bf16[4,8], index: 2, kind: input, shape index: {}]   ;;  %s1465_s3 = inlined_call_operand.vmem [shape: bf16[4,8], index: 3, kind: input, shape index: {}]   ;;  %s1466_s4 = inlined_call_operand.vmem [shape: f32[4,1], index: 4, kind: input, shape index: {}]   ;;  %s1467_s5 = inlined_call_operand.vmem [shape: bf16[1,4], index: 5, kind: input, shape index: {}]   ;;  %s1468_s6 = inlined_call_operand.<no memory space> [shape: f32[1], index: 6, kind: input, shape index: {}]   ;;  %s1469_s7 = inlined_call_operand.hbm [shape: f32[2,8,256], index: 7, kind: output, shape index: {0}]   ;;  %s1470_s8 = inlined_call_operand.hbm [shape: f32[2,1,256], index: 8, kind: output, shape index: {1}]  }
   0x1   :  { %1476 = sst [smem:[#allocation16_spill]] %s1462_s0 }
   0x2   :  { %14 = sst [smem:[#allocation2]] %s1468_s6 }
   0x3   :  { %15 = vsyncpa [#allocation4], 0 }
   0x4   :  { %17 = vsyncpa [#allocation4 + $0x1], 0 }
   0x5   :  { %18 = vsyncpa [#allocation7], 0 }
   0x6   :  { %20 = vsyncpa [#allocation7 + $0x1], 0 }
   0x7   :  { %21 = vsyncpa [#allocation5], 0 }
   0x8   :  { %23 = vsyncpa [#allocation5 + $0x1], 0 }
   0x9   :  { %24 = vsyncpa [#allocation10], 0 }
   0xa   :  { %26 = vsyncpa [#allocation10 + $0x1], 0  ;;  %s1180_s29 = smov 0   ;;  %s1182_s30 = smov 0  }
   0xb   :  { %s1184_s9 = smov 0   ;;  %s1186_s10 = smov 0  }
   0xc   :  { %s1188_s11 = smov 0   ;;  %s1190_s12 = smov 0  }
   0xd LB: > { %s822_s6 = sadd.s32 4294967295, %s1124_s12   ;;  %s823_s13 = sadd.s32 4294967294, %s1124_s12   ;;  %s1124_s12 = sphi %s1190_s12, %s32_s12   ;;  %s1120_s11 = sphi %s1188_s11, %s1501_s11   ;;  %s1116_s10 = sphi %s1186_s10, %s1500_s10   ;;  %s1112_s9 = sphi %s1184_s9, %s1499_s9   ;;  %s1108_s30 = sphi %s1182_s30, %s1498_s30   ;;  %s1104_s29 = sphi %s1180_s29, %s1497_s29  }
   0xe   : > { %s44_s14 = sadd.s32 1, %s1120_s11  ;;  %s53_s15 = sadd.s32 1, %s1112_s9 }
   0xf   : > { %p46_p0 = scmp.ge.s32.totalorder %s44_s14, 2  ;;  %p60_p1 = scmp.ne.s32.totalorder %s1112_s9, %s1108_s30 }
  0x10   : > { %p61_p2 = scmp.eq.s32.totalorder %s1124_s12, 0  ;;  %p66_p3 = scmp.ne.s32.totalorder %s1108_s30, %s1104_s29 }
  0x11   : > { %s1503_s14 = smov (%p46_p0, %s44_s14), 0  ;;  %p67_p5 = scmp.eq.s32.totalorder %s822_s6, 0 }
  0x12   : > { %1477 = sst [smem:[#allocation15_spill]] %s1503_s14  ;;  %p1221_p4 = por %p61_p2, %p60_p1 }
  0x13   : > { %s48_s17 = ssub.s32 %s1120_s11, %s1503_s14  ;;  %p225_p6 = scmp.eq.s32.totalorder %s822_s6, 1 }
  0x14   : > { %p51_p7 = scmp.eq.s32.totalorder %s48_s17, 0  ;;  %p1227_p8 = por %p67_p5, %p66_p3 }
  0x15   : > { %p1231_p9 = por %p225_p6, %p60_p1  ;;  %p231_p10 = scmp.eq.s32.totalorder %s823_s13, 1 }
  0x16   : > { %s1479_s18 = scalar_select %p1227_p8, 1, 0 }
  0x17   : > { %s1480_s19 = scalar_select %p1231_p9, 1, 0 }
  0x18   : > { %s1236_s20 = scalar_select %p51_p7, %s1112_s9, %s53_s15  }
  0x19   : > { %p1238_p11 = por %p231_p10, %p66_p3  ;;  %p881_p13 = scmp.lt.s32.totalorder %s1124_s12, 2 }
  0x1a   : > { %s1245_s22 = sand.u32 1, %s1112_s9   ;;  %s1472_s24 = sshll.u32 %s1120_s11, 7 }
  0x1b   : > { %s1481_s21 = scalar_select %p1238_p11, 1, 0 }
  0x1c   : > { %s1471_s23 = sshll.u32 %s1245_s22, 3  ;;  %s1482_s0 = sld [smem:[#allocation16_spill]] }
  0x1d   : > { %s298_s28 = scalar_lea.vmem [#allocation3], %s1471_s23  ;;  %p1262_p0 = pnand %p881_p13, %p1221_p4 }
  0x1e   : > { %s308_s6 = sshll.u32 %s298_s28, 4  ;;  %s295_s15 = scalar_lea.sflag [#allocation4], %s1245_s22  ;;  %s1258_s6 = int_to_ptr.vmem [resolvable:$true] %s308_s6 }
  0x1f   : > { %p948_p5 = pneg %p1262_p0 }
  0x22   : > { %s1254_s27 = scalar_lea.hbm %s1482_s0, %s1472_s24  ;;  %s951_s16 = scalar_lea.hbm %s1482_s0, 256 }
  0x23   : > { %s946_s17 = scalar_lea.hbm %s1254_s27, 128  ;;  %p952_p4 = scmp.lt.u32.totalorder %s1254_s27, %s1482_s0 }
  0x24   : > { %p947_p3 = scmp.ne.s32.totalorder %s1254_s27, %s946_s17  ;;  %p953_p10 = scmp.lt.u32.totalorder %s951_s16, %s946_s17 }
  0x25   : > { %p955_p12 = scmp.lt.u32.totalorder %s946_s17, %s1254_s27 }
  0x26   : > { %p949_p6 = pnand %p948_p5, %p947_p3  ;;  %p954_p13 = por %p953_p10, %p952_p4 }
  0x28   : > { %p950_p7 = pneg %p949_p6  ;;  %p956_p1 = por %p955_p12, %p954_p13 }
  0x2a   : > { %p957_p2 = pnand %p956_p1, %p950_p7 }
  0x2c   : > { %960 = shalt.err (!%p957_p2)
}
  0x2d   : > { %s961_s24 = scalar_lea.vmem %s1258_s6, 128  ;;  %s1126_s25 = smov [#allocation3]  }
  0x2e   : > { %p962_p3 = scmp.ne.s32.totalorder %s1258_s6, %s961_s24  ;;  %s966_s26 = sshll.u32 %s1126_s25, 4  ;;  %s967_s26 = int_to_ptr.vmem [resolvable:$false] %s966_s26 }
  0x2f   : > { %s968_s23 = scalar_lea.vmem %s967_s26, 256  ;;  %p969_p9 = scmp.lt.s32.totalorder %s1258_s6, %s967_s26 }
  0x30   : > { %p964_p6 = pnand %p962_p3, %p948_p5  ;;  %p970_p4 = scmp.lt.s32.totalorder %s968_s23, %s961_s24 }
  0x32   : > { %p965_p11 = pneg %p964_p6  ;;  %p971_p10 = por %p970_p4, %p969_p9 }
  0x34   : > { %p972_p12 = pnand %p971_p10, %p965_p11 }
  0x36   : > { %975 = shalt.err (!%p972_p12)
}
  0x37   : > { %870 = dma.hbm_to_vmem [thread:$0]  (!%p1262_p0), %s1254_s27, 128, %s1258_s6, %s295_s15  }
  0x38   : > { %p1484_p1 = scmp.lt.s32.totalorder %s1124_s12, 3  ;;  %p1485_p2 = scmp.ge.s32.totalorder %s1124_s12, 1 }
  0x39   : > { %s1487_s24 = sshll.u32 %s1120_s11, 7  ;;  %s1488_s26 = sshll.u32 %s1245_s22, 3 }
  0x3a   : > { %p1298_p7 = pnand %p1485_p2, %p1484_p1  ;;  %s1307_s25 = scalar_lea.hbm %s1463_s1, %s1487_s24 }
  0x3b   : > { %s319_s23 = scalar_lea.vmem [#allocation6], %s1488_s26  ;;  %s316_s27 = scalar_lea.sflag [#allocation7], %s1245_s22 }
  0x3c   : > { %s1486_s17 = scalar_select %p1298_p7, 1, 0 }
  0x3d   : > { %s329_s0 = sshll.u32 %s319_s23, 4  ;;  %s976_s6 = scalar_lea.hbm %s1307_s25, 128  ;;  %s330_s0 = int_to_ptr.vmem [resolvable:$true] %s329_s0 }
  0x3e   : > { %p977_p9 = scmp.ne.s32.totalorder %s1307_s25, %s976_s6  ;;  %s981_s24 = scalar_lea.hbm %s1463_s1, 256 }
  0x3f   : > { %p982_p3 = scmp.lt.u32.totalorder %s1307_s25, %s1463_s1  ;;  %p983_p6 = scmp.lt.u32.totalorder %s981_s24, %s976_s6 }
  0x40   : > { %p979_p11 = pnand %p977_p9, %p948_p5  ;;  %p985_p10 = scmp.lt.u32.totalorder %s976_s6, %s1307_s25 }
  0x41   : > { %p984_p4 = por %p983_p6, %p982_p3 }
  0x42   : > { %p980_p13 = pneg %p979_p11 }
  0x43   : > { %p986_p12 = por %p985_p10, %p984_p4 }
  0x45   : > { %p987_p1 = pnand %p986_p12, %p980_p13 }
  0x47   : > { %990 = shalt.err (!%p987_p1)
}
  0x48   : > { %s991_s22 = scalar_lea.vmem %s330_s0, 128  ;;  %s1127_s26 = smov [#allocation6]  }
  0x49   : > { %p992_p2 = scmp.ne.s32.totalorder %s330_s0, %s991_s22  ;;  %s996_s14 = sshll.u32 %s1127_s26, 4  ;;  %s997_s14 = int_to_ptr.vmem [resolvable:$false] %s996_s14 }
  0x4a   : > { %s998_s23 = scalar_lea.vmem %s997_s14, 256  ;;  %p999_p8 = scmp.lt.s32.totalorder %s330_s0, %s997_s14 }
  0x4b   : > { %p994_p9 = pnand %p992_p2, %p948_p5  ;;  %p1000_p7 = scmp.lt.s32.totalorder %s998_s23, %s991_s22 }
  0x4d   : > { %p995_p11 = pneg %p994_p9  ;;  %p1001_p3 = por %p1000_p7, %p999_p8 }
  0x4f   : > { %p1002_p6 = pnand %p1001_p3, %p995_p11 }
  0x51   : > { %1005 = shalt.err (!%p1002_p6)
}
  0x52   : > { %873 = dma.hbm_to_vmem [thread:$0]  (!%p1262_p0), %s1307_s25, 128, %s330_s0, %s316_s27  }
  0x53   : > { %p1489_p13 = scmp.ne.s32.totalorder %s1486_s17, 0 }
  0x54   : > { %s1334_s6 = sand.u32 (!%p1489_p13), 1, %s1108_s30   ;;  %p1490_p5 = scmp.ne.s32.totalorder (!%p1489_p13), %s1479_s18, 0 }
  0x55   : > { %338 = sbr.rel (%p1489_p13) target bundleno = 617 (0x269), region = 48  ;;  %s833_s15 = sshll.u32 (!%p1489_p13), %s1334_s6, 3 }
  0x56   : > { %s341_s24 = scalar_lea.sflag (!%p1489_p13), [#allocation4], %s1334_s6  ;;  %s344_s16 = scalar_lea.vmem (!%p1489_p13), [#allocation3], %s833_s15 }
  0x5c   : > { %1087 = dma.done.wait (%p1490_p5), %s341_s24, 128  }
  0x5d   : > { %1089 = vsyncadd (%p1490_p5), %s341_s24, 4294967168  ;;  %s350_s0 = scalar_lea.sflag [#allocation7], %s1334_s6  ;;  %s353_s13 = scalar_lea.vmem [#allocation6], %s833_s15 }
  0x5e   : > { %1091 = dma.done.wait (%p1490_p5), %s350_s0, 128  }
  0x5f   : > { %1093 = vsyncadd (%p1490_p5), %s350_s0, 4294967168  ;;  %v1128_v0 = vmov 0   ;;  %v1347_v1 = vld [vmem:[%s353_s13] sm:$0xff]  ;;  %vm414_vm0 = vcmask 1043456   ;;  %v401_v2 = vld [vmem:[%s344_s16] sm:$0xff]  ;;  %vm410_vm1 = vcmask 64512   ;;  %v608_v48 = vlaneseq }
  0x60   : > { %453 = vmatprep.mubr.bf16.mxu0 %v1128_v0  ;;  %508 = vmatprep.mubr.bf16.mxu1 %v1128_v0  ;;  %v838_v3 = vcombine.high %v1347_v1, %v1347_v1  ;;  %v842_v4 = vcombine.high %v401_v2, %v401_v2  ;;  %v517_v5 = vld [vmem:[%s1466_s4] sm:$0xf]  ;;  %v837_v6 = vcombine.low %v1347_v1, %v1347_v1  ;;  %vm536_vm2 = vcmask 1041408   ;;  %s530_s23 = sld [smem:[#allocation2]]  ;;  %s835_s15 = sshll.u32 %s1334_s6, 4 }
  0x61   : > { %933 = vset.pattern.permute.xlu0 %v1128_v0  ;;  %v841_v7 = vcombine.low %v401_v2, %v401_v2  ;;  %v404_v10 = vld [vmem:[%s1465_s3] sm:$0x3]  ;;  %vm532_vm3 = vcmask 31744   ;;  %v1129_v49 = vmov 1966171168   ;;  %v609_v51 = vshrl.u32 %v608_v48, 7 }
  0x62   : > { %520 = vperm.xlu0 %933, %v517_v5   ;;  %839 = vmatprep.subr.msk.bf16.mxu0 %vm414_vm0, %v838_v3  ;;  %v416_v8 = vsel %vm414_vm0, %v837_v6, 0  ;;  %v403_v11 = vld [vmem:[%s1464_s2] sm:$0x3]  ;;  %v606_v50 = vunpack.c.l.s4 %v1129_v49  ;;  %s836_s24 = sshll.u32 %s1334_s6, 1  ;;  %v625_v57 = vunpack.c.l.bf16 %v1347_v1  ;;  %v626_v59 = vunpack.c.h.bf16 %v1347_v1  ;;  %s857_s16 = sshll.u32 %s1116_s10, 8 }
  0x63   : > { %843 = vmatprep.subr.msk.bf16.mxu1 %vm414_vm0, %v842_v4  ;;  %v471_v9 = vsel %vm414_vm0, %v841_v7, 0  ;;  %422 = vmatpush1.bf16.msra.mxu0 %v416_v8  ;;  %v527_v30 = vld [vmem:[%s1467_s5] sm:$0x1]  ;;  %v629_v54 = vsub.s32 0, %v609_v51  ;;  %s388_s0 = scalar_lea.vmem [#allocation8], %s835_s15  ;;  %s858_s17 = sshll.u32 %s1116_s10, 5 }
  0x64   : > { %477 = vmatpush1.bf16.msra.mxu1 %v471_v9  ;;  %v607_v52 = vunpack.c.0.s8 %v606_v50  ;;  %s661_s13 = sshll.u32 %s388_s0, 4  ;;  %s1371_s25 = scalar_lea.vmem [#allocation9], %s836_s24  ;;  %vm1381_vm6 = vcmp.lt.s32.totalorder %v608_v48, 256  ;;  %s1379_s13 = int_to_ptr.vmem [resolvable:$true] %s661_s13 }
  0x65   : > { %s677_s18 = sshll.u32 %s1371_s25, 4  ;;  %s1377_s22 = scalar_lea.hbm %s1469_s7, %s857_s16  ;;  %s1390_s18 = int_to_ptr.vmem [resolvable:$true] %s677_s18 }
  0x66   : > { %840 = vmatmul.mubr.msk.bf16.vlgmr.msra.gmra.mrb[0].mxu0 %vm410_vm1, %v404_v10  ;;  %v531_v31 = vstv %s530_s23  ;;  %v610_v61 = vsub.s32 %v607_v52, %v609_v51  ;;  %s1388_s14 = scalar_lea.hbm %s1470_s8, %s858_s17  ;;  %s640_s23 = scalar_lea.sflag [#allocation5], %s1334_s6 }
  0x67   : > { %844 = vmatmul.mubr.msk.bf16.vlgmr.msra.gmra.mrb[0].mxu1 %vm410_vm1, %v403_v11  ;;  %575 = vmatprep.mubr.bf16.mxu0 %v1128_v0  ;;  %s1006_s15 = scalar_lea.vmem %s1379_s13, 256  ;;  %p1493_p0 = scmp.ne.s32.totalorder %s1480_s19, 0 }
  0x68   : > { %p1007_p8 = scmp.ne.s32.totalorder %s1379_s13, %s1006_s15  ;;  %s1130_s24 = smov [#allocation8]  }
  0x69   : > { %s1010_s16 = sshll.u32 %s1130_s24, 4  ;;  %s1011_s16 = int_to_ptr.vmem [resolvable:$false] %s1010_s16 }
  0x6a   : > { %p1008_p7 = pnand %p1007_p8, %p1493_p0  ;;  %s1012_s27 = scalar_lea.vmem %s1011_s16, 512 }
  0x6b   : > { %p1013_p10 = scmp.lt.s32.totalorder %s1379_s13, %s1011_s16  ;;  %p1014_p12 = scmp.lt.s32.totalorder %s1012_s27, %s1006_s15 }
  0x6c   : > { %p1009_p4 = pneg %p1008_p7 }
  0x6d   : > { %p1015_p1 = por %p1014_p12, %p1013_p10 }
  0x6f   : > { %p1016_p2 = pnand %p1015_p1, %p1009_p4 }
  0xe1   : > { %v521_v12 = vpop.permute.xlu0 %520 }
 0x139   : > { %v455_v13 = vpop.f32.mrb[0].mxu0 }
 0x13a   : > { %v510_v14 = vpop.f32.mrb[0].mxu1  ;;  %v457_v16 = vpop.f32.mrb[1].mxu0 }
 0x13b   : > { %v511_v15 = vadd.f32 %v510_v14, %v455_v13  ;;  %v512_v17 = vpop.f32.mrb[1].mxu1  ;;  %v459_v19 = vpop.f32.mrb[2].mxu0 }
 0x13c   : > { %v513_v18 = vadd.f32 %v512_v17, %v457_v16  ;;  %v514_v20 = vpop.f32.mrb[2].mxu1  ;;  %v460_v22 = vpop.f32.mrb[3].mxu0 }
 0x13d   : > { %v523_v21 = vadd.f32 %v521_v12, %v511_v15  ;;  %v515_v23 = vpop.f32.mrb[3].mxu1 }
 0x13e   : > { %v524_v24 = vadd.f32 %v521_v12, %v513_v18 }
 0x13f   : > { %v525_v25 = vmax.f32 %v523_v21, 0.0 }
 0x140   : > { %v526_v26 = vmax.f32 %v524_v24, 0.0 }
 0x141   : > { %v528_v27 = vpack.c.bf16 %v525_v25, %v525_v25 }
 0x142   : > { %v529_v28 = vpack.c.bf16 %v526_v26, %v526_v26 }
 0x143   : > { %v538_v29 = vsel %vm536_vm2, %v528_v27, 0 }
 0x144   : > { %845 = vmatprep.subr.msk.bf16.mxu0 %vm536_vm2, %v529_v28 }
 0x145   : > { %544 = vmatpush1.bf16.msra.mxu0 %v538_v29 }
 0x148   : > { %846 = vmatmul.mubr.msk.bf16.vlgmr.msra.gmra.mrb[4].mxu0 %vm532_vm3, %v527_v30 }
 0x21b   : > { %v577_v32 = vpop.f32.mrb[4].mxu0 }
 0x21c   : > { %v578_v33 = vadd.f32 %v577_v32, %v531_v31  ;;  %v579_v34 = vpop.f32.mrb[5].mxu0 }
 0x21d   : > { %v580_v35 = vadd.f32 %v579_v34, %v531_v31  ;;  %v581_v36 = vpop.f32.mrb[6].mxu0 }
 0x21e   : > { %v584_v37 = vand.u32 2147483647, %v578_v33  ;;  %v582_v38 = vpop.f32.mrb[7].mxu0  ;;  %vm596_vm4 = vcmp.ge.f32.partialorder %v578_v33, 0.0 }
 0x21f   : > { %v585_v39 = vand.u32 2147483647, %v580_v35  ;;  %vm597_vm5 = vcmp.ge.f32.partialorder %v580_v35, 0.0 }
 0x220   : > { %v586_v40 = vsub.f32 0.0, %v584_v37 }
 0x221   : > { %v587_v41 = vsub.f32 0.0, %v585_v39 }
 0x222   : > { %v588_v42 = vmul.f32 1.442695, %v586_v40 }
 0x223   : > { %v590_v43 = vmul.f32 1.442695, %v587_v41 }
 0x224   : > { %938 = vpow2.f32 %v588_v42 }
 0x225   : > { %940 = vpow2.f32 %v590_v43 }
 0x22e   : > { %v939_v44 = vpop.eup %938 }
 0x22f   : > { %v941_v45 = vpop.eup %940  ;;  %v592_v46 = vadd.f32 1.0, %v939_v44 }
 0x230   : > { %v593_v47 = vadd.f32 1.0, %v941_v45 }
 0x231   : > { %942 = vrcp.f32 %v592_v46 }
 0x232   : > { %944 = vrcp.f32 %v593_v47 }
 0x23b   : > { %v943_v53 = vpop.eup %942 }
 0x23c   : > { %v945_v55 = vpop.eup %944  ;;  %v598_v56 = vmul.f32 %v943_v53, %v939_v44 }
 0x23d   : > { %v599_v58 = vmul.f32 %v945_v55, %v941_v45 }
 0x23e   : > { %v600_v60 = vsel %vm596_vm4, %v943_v53, %v598_v56 }
 0x23f   : > { %v630_v62 = vrot.slane %v600_v60, %v629_v54  ;;  %v601_v63 = vsel %vm597_vm5, %v945_v55, %v599_v58 }
 0x240   : > { %v604_v0 = vcombine.low %v600_v60, %v601_v63  ;;  %v634_v2 = vrot.slane %v601_v63, %v629_v54 }
 0x241   : > { %v635_v3 = vmul.f32 %v630_v62, %v625_v57 }
 0x242   : > { %v611_v4 = vrot.slane %v604_v0, %v610_v61  ;;  %v636_v1 = vmul.f32 %v634_v2, %v626_v59 }
 0x243   : > { %637 = vst [vmem:[%s388_s0] sm:$0xff] %v635_v3 }
 0x244   : > { %v618_v6 = vrot.slane %v611_v4, %v610_v61  ;;  %638 = vst [vmem:[%s388_s0 + $0x8] sm:$0xff] %v636_v1 }
 0x245   : > { %1019 = shalt.err (!%p1016_p2)
}
 0x246   : > { %s1020_s0 = scalar_lea.hbm %s1377_s22, 256  ;;  %s1024_s10 = scalar_lea.hbm %s1469_s7, 512 }
 0x247   : > { %p1021_p9 = scmp.ne.s32.totalorder %s1377_s22, %s1020_s0  ;;  %p1025_p6 = scmp.lt.u32.totalorder %s1377_s22, %s1469_s7 }
 0x248   : > { %p1026_p13 = scmp.lt.u32.totalorder %s1024_s10, %s1020_s0  ;;  %p1028_p8 = scmp.lt.u32.totalorder %s1020_s0, %s1377_s22 }
 0x249   : > { %p1022_p11 = pnand %p1021_p9, %p1493_p0 }
 0x24a   : > { %p1027_p5 = por %p1026_p13, %p1025_p6 }
 0x24b   : > { %p1023_p3 = pneg %p1022_p11 }
 0x24c   : > { %p1029_p7 = por %p1028_p8, %p1027_p5 }
 0x24e   : > { %p1030_p4 = pnand %p1029_p7, %p1023_p3 }
 0x250   : > { %1033 = shalt.err (!%p1030_p4)
}
 0x251   : > { %863 = dma.vmem_to_hbm [thread:$0]  (%p1493_p0), %s1379_s13, 256, %s1377_s22, %s640_s23   ;;  %624 = vst.msk [vmem:[%s1371_s25] sm:$0x3] %vm1381_vm6, %v618_v6 }
 0x252   : > { %s645_s15 = scalar_lea.sflag [#allocation10], %s1334_s6  ;;  %s1034_s16 = scalar_lea.vmem %s1390_s18, 32 }
 0x253   : > { %p1035_p10 = scmp.ne.s32.totalorder %s1390_s18, %s1034_s16  ;;  %s1131_s27 = smov [#allocation9]  }
 0x254   : > { %s1038_s0 = sshll.u32 %s1131_s27, 4  ;;  %s1039_s0 = int_to_ptr.vmem [resolvable:$false] %s1038_s0 }
 0x255   : > { %p1036_p12 = pnand %p1035_p10, %p1493_p0  ;;  %s1040_s17 = scalar_lea.vmem %s1039_s0, 64 }
 0x256   : > { %p1041_p2 = scmp.lt.s32.totalorder %s1390_s18, %s1039_s0  ;;  %p1042_p9 = scmp.lt.s32.totalorder %s1040_s17, %s1034_s16 }
 0x257   : > { %p1037_p1 = pneg %p1036_p12 }
 0x258   : > { %p1043_p11 = por %p1042_p9, %p1041_p2 }
 0x25a   : > { %p1044_p3 = pnand %p1043_p11, %p1037_p1 }
 0x25c   : > { %1047 = shalt.err (!%p1044_p3)
}
 0x25d   : > { %s1048_s6 = scalar_lea.hbm %s1388_s14, 32  ;;  %s1052_s22 = scalar_lea.hbm %s1470_s8, 64 }
 0x25e   : > { %p1049_p6 = scmp.ne.s32.totalorder %s1388_s14, %s1048_s6  ;;  %p1053_p8 = scmp.lt.u32.totalorder %s1388_s14, %s1470_s8 }
 0x25f   : > { %p1054_p7 = scmp.lt.u32.totalorder %s1052_s22, %s1048_s6  ;;  %p1056_p10 = scmp.lt.u32.totalorder %s1048_s6, %s1388_s14 }
 0x260   : > { %p1050_p13 = pnand %p1049_p6, %p1493_p0 }
 0x261   : > { %p1055_p4 = por %p1054_p7, %p1053_p8 }
 0x262   : > { %p1051_p5 = pneg %p1050_p13 }
 0x263   : > { %p1057_p12 = por %p1056_p10, %p1055_p4 }
 0x265   : > { %p1058_p1 = pnand %p1057_p12, %p1051_p5 }
 0x267   : > { %1061 = shalt.err (!%p1058_p1)
}
 0x268   : > { %864 = dma.vmem_to_hbm [thread:$0]  (%p1493_p0), %s1390_s18, 32, %s1388_s14, %s645_s15  }
 0x269 PF: > { %s689_s10 = sand.u32 1, %s1104_s29   ;;  %p1494_p2 = scmp.ne.s32.totalorder %s1481_s21, 0 }
 0x26a   : > { %p1495_p9 = scmp.ge.s32.totalorder %s1124_s12, 2  ;;  %s690_s26 = scalar_lea.sflag [#allocation5], %s689_s10 }
 0x26c   : > { %p875_p11 = pnand %p1495_p9, %p1494_p2 }
 0x26e   : > { %1095 = dma.done.wait (!%p875_p11), %s690_s26, 256  }
 0x26f   : > { %1097 = vsyncadd (!%p875_p11), %s690_s26, 4294967040  ;;  %s699_s24 = scalar_lea.sflag [#allocation10], %s689_s10 }
 0x270   : > { %1099 = dma.done.wait (!%p875_p11), %s699_s24, 32  }
 0x271   : > { %1101 = vsyncadd (!%p875_p11), %s699_s24, 4294967264  ;;  %s32_s12 = sadd.s32 1, %s1124_s12   ;;  %s1496_s19 = sld [smem:[#allocation15_spill]] }
 0x272   : > { %p29_p3 = scmp.ge.s32.totalorder %s32_s12, 4   ;;  %s1497_s29 = smov %s1108_s30 }
 0x273   : > { %s1498_s30 = smov %s1112_s9  ;;  %s1499_s9 = smov %s1236_s20 }
 0x274   : > { %s1500_s10 = smov %s1120_s11  ;;  %31 = sbr.rel (!%p29_p3) target bundleno = 13 (0xd), region = 123 }
 0x277   : > { %s1501_s11 = smov %s1496_s19 }
 0x27b   :  { %704 = vsyncpa [#allocation4], 1 }
 0x27c   :  { %706 = vsyncpa [#allocation4 + $0x1], 1 }
 0x27d   :  { %707 = vsyncpa [#allocation7], 1 }
 0x27e   :  { %709 = vsyncpa [#allocation7 + $0x1], 1 }
 0x27f   :  { %710 = vsyncpa [#allocation5], 1 }
 0x280   :  { %712 = vsyncpa [#allocation5 + $0x1], 1 }
 0x281   :  { %713 = vsyncpa [#allocation10], 1 }
 0x282   :  { %715 = vsyncpa [#allocation10 + $0x1], 1 }

</bundles_post_ra>
